<compile_context>
chip_gen: v5e
topology: v5e:2x2
jax: 0.10.0
libtpu: 0.0.40
codegen_flags: <defaults>
</compile_context>

<pallas_src>
import jax
import jax.numpy as jnp
from jax.experimental import pallas as pl
from jax.experimental.pallas import tpu as pltpu


def _masked_scale_kernel(x_ref, m_ref, o_ref):
    # Mask block is size-1 along the locked (time) axis; jnp broadcasting
    # expands it across the x block.  Compute stays in x.dtype.
    o_ref[...] = x_ref[...] * m_ref[...]


def _chip_budget():
    """Return (target_tile_bytes, vmem_limit_bytes, tensorcores_per_chip)."""
    vmem_cap = None
    try:
        vmem_cap = int(pltpu.get_tpu_info().vmem_capacity_bytes)
    except Exception:
        vmem_cap = None
    if vmem_cap is not None and vmem_cap > 64 * 1024 * 1024:
        # v5e / v6e class: 128 MiB VMEM, single TensorCore per chip.
        return 8 * 1024 * 1024, 64 * 1024 * 1024, 1
    # v7x class (64 MiB VMEM per TC, 2 TCs) or unknown: stay conservative.
    return 4 * 1024 * 1024, 48 * 1024 * 1024, 2


def _tile(dim, unit, target):
    """Largest block <= target that is a multiple of `unit`, or the full dim."""
    if dim <= target:
        return dim
    return max((target // unit) * unit, unit)


def _shrink_for_steps(dim, tile, unit, want_steps):
    """Shrink `tile` so cdiv(dim, tile) >= want_steps, best effort at `unit`
    granularity.  Never grows the tile."""
    if want_steps <= 1:
        return tile
    t = -(-dim // want_steps)                 # ceil(dim / want_steps)
    t = max(unit, (t // unit) * unit)
    return min(tile, t)


def locked_dropout(x, key, dropout=0.5, training=True, batch_first=False):
    """LockedDropout forward.

    x:   (T, B, H) if batch_first=False, else (B, T, H).
    key: jax.random PRNG key controlling the (deterministic) mask.
    """
    if (not training) or (not dropout):
        return x

    keep = 1.0 - float(dropout)
    itemsize = jnp.dtype(x.dtype).itemsize
    sub = max(8, 32 // itemsize)              # dtype-aware sublane unit
    target_bytes, vmem_limit, n_cores = _chip_budget()
    max_elems = max(sub * 128, target_bytes // itemsize)
    min_steps = 2 * n_cores if n_cores > 1 else 1

    if not batch_first:
        # x: (T, B, H); one mask value per (b, h), locked across T.
        T, B, H = x.shape
        BH = B * H
        mask = (jax.random.bernoulli(key, p=keep, shape=(B, H))
                .astype(jnp.float32) * (1.0 / keep)).astype(x.dtype)
        x2 = x.reshape(T, BH)
        m2 = mask.reshape(1, BH)

        # Joint row/lane sizing so every step moves ~target_bytes.
        lane_t = _tile(BH, 128, max(128, max_elems // sub))
        row_t = _tile(T, sub, max(sub, max_elems // lane_t))

        # v7x: make sure both TensorCores get work (best effort).
        steps = pl.cdiv(T, row_t) * pl.cdiv(BH, lane_t)
        if steps < min_steps:
            row_t = _shrink_for_steps(
                T, row_t, sub, pl.cdiv(min_steps, pl.cdiv(BH, lane_t)))
            steps = pl.cdiv(T, row_t) * pl.cdiv(BH, lane_t)
        if steps < min_steps:
            lane_t = _shrink_for_steps(
                BH, lane_t, 128, pl.cdiv(min_steps, pl.cdiv(T, row_t)))

        # Lane-tiles outer, row-tiles inner: the (1, lane_t) mask block index
        # is constant across the inner axis, so it stays resident in VMEM
        # while x streams through.
        grid = (pl.cdiv(BH, lane_t), pl.cdiv(T, row_t))

        out2 = pl.pallas_call(
            _masked_scale_kernel,
            out_shape=jax.ShapeDtypeStruct((T, BH), x.dtype),
            grid_spec=pltpu.PrefetchScalarGridSpec(
                num_scalar_prefetch=0,
                grid=grid,
                in_specs=[
                    pl.BlockSpec((row_t, lane_t), lambda j, i: (i, j)),
                    pl.BlockSpec((1, lane_t), lambda j, i: (0, j)),
                ],
                out_specs=pl.BlockSpec((row_t, lane_t), lambda j, i: (i, j)),
            ),
            compiler_params=pltpu.CompilerParams(
                dimension_semantics=("parallel", "parallel"),
                vmem_limit_bytes=vmem_limit,
            ),
            cost_estimate=pl.CostEstimate(
                flops=T * BH,
                transcendentals=0,
                bytes_accessed=(2 * T * BH + BH) * itemsize),
        )(x2, m2)
        return out2.reshape(T, B, H)

    # batch_first=True: x is (B, T, H); one mask value per (b, h), locked
    # across T.  No wrapper transpose; multiple batch rows per block when
    # T*H is small.
    B, T, H = x.shape
    mask = (jax.random.bernoulli(key, p=keep, shape=(B, H))
            .astype(jnp.float32) * (1.0 / keep)).astype(x.dtype)
    m3 = mask.reshape(B, 1, H)

    h_t = _tile(H, 128, max(128, max_elems // sub))
    t_t = _tile(T, sub, max(sub, max_elems // h_t))
    b_t = _tile(B, 1, max(1, max_elems // (h_t * t_t)))

    def _steps():
        return pl.cdiv(B, b_t) * pl.cdiv(T, t_t) * pl.cdiv(H, h_t)

    if _steps() < min_steps:
        b_t = _shrink_for_steps(
            B, b_t, 1,
            pl.cdiv(min_steps, pl.cdiv(T, t_t) * pl.cdiv(H, h_t)))
    if _steps() < min_steps:
        t_t = _shrink_for_steps(
            T, t_t, sub,
            pl.cdiv(min_steps, pl.cdiv(B, b_t) * pl.cdiv(H, h_t)))
    if _steps() < min_steps:
        h_t = _shrink_for_steps(
            H, h_t, 128,
            pl.cdiv(min_steps, pl.cdiv(B, b_t) * pl.cdiv(T, t_t)))

    # Time-tiles innermost: the (b_t, 1, h_t) mask block stays resident in
    # VMEM while x streams over T.
    grid = (pl.cdiv(B, b_t), pl.cdiv(H, h_t), pl.cdiv(T, t_t))

    out = pl.pallas_call(
        _masked_scale_kernel,
        out_shape=jax.ShapeDtypeStruct((B, T, H), x.dtype),
        grid_spec=pltpu.PrefetchScalarGridSpec(
            num_scalar_prefetch=0,
            grid=grid,
            in_specs=[
                pl.BlockSpec((b_t, t_t, h_t), lambda b, j, i: (b, i, j)),
                pl.BlockSpec((b_t, 1, h_t), lambda b, j, i: (b, 0, j)),
            ],
            out_specs=pl.BlockSpec((b_t, t_t, h_t), lambda b, j, i: (b, i, j)),
        ),
        compiler_params=pltpu.CompilerParams(
            dimension_semantics=("parallel", "parallel", "parallel"),
            vmem_limit_bytes=vmem_limit,
        ),
        cost_estimate=pl.CostEstimate(
            flops=B * T * H,
            transcendentals=0,
            bytes_accessed=(2 * B * T * H + B * H) * itemsize),
    )(x, m3)
    return out


if __name__ == "__main__":
    key = jax.random.PRNGKey(0)
    kx, km = jax.random.split(key)

    T, B, H = 8, 2, 128
    x = jax.random.normal(kx, (T, B, H), dtype=jnp.float32)
    dropout = 0.5
    scale = 1.0 / (1.0 - dropout)

    # Time-major (batch_first=False) path.
    out = jax.block_until_ready(
        locked_dropout(x, km, dropout=dropout, training=True,
                       batch_first=False))
    ratio = out / jnp.where(x == 0, 1.0, x)
    assert bool(jnp.all(jnp.isclose(ratio, 0.0) | jnp.isclose(ratio, scale))), \
        "values not in {0, x/(1-p)}"
    assert bool(jnp.all(jnp.isclose(ratio, ratio[0:1]))), \
        "mask not locked across time axis"

    # batch_first=True path (no wrapper transposes inside the op).
    xb = jnp.transpose(x, (1, 0, 2))  # (B, T, H), for test construction only
    outb = jax.block_until_ready(
        locked_dropout(xb, km, dropout=dropout, training=True,
                       batch_first=True))
    ratiob = outb / jnp.where(xb == 0, 1.0, xb)
    assert bool(jnp.all(jnp.isclose(ratiob, 0.0) | jnp.isclose(ratiob, scale))), \
        "batch_first values not in {0, x/(1-p)}"
    assert bool(jnp.all(jnp.isclose(ratiob, ratiob[:, 0:1]))), \
        "batch_first mask not locked across time axis"

    # Eval-mode path is identity.
    out_eval = jax.block_until_ready(
        locked_dropout(x, km, dropout=dropout, training=False))
    assert bool(jnp.all(out_eval == x))

    print("KERNEL_OK")
</pallas_src>

<mosaic_0001>
module attributes {stable_mosaic.version = 11 : i64} {
  func.func @_masked_scale_kernel(%arg0: i32, %arg1: i32, %arg2: memref<8x128xf32, #tpu.memory_space<vmem>>, %arg3: memref<1x128xf32, #tpu.memory_space<vmem>>, %arg4: memref<8x128xf32, #tpu.memory_space<vmem>>) attributes {dimension_semantics = [#tpu.dimension_semantics<parallel>, #tpu.dimension_semantics<parallel>], iteration_bounds = array<i64: 2, 1>, scalar_prefetch = 0 : i64, scratch_operands = 0 : i64, tpu.core_type = #tpu.core_type<tc>, window_params = [{transform_indices = @transform_0, window_bounds = array<i64: 8, 128>}, {transform_indices = @transform_1, window_bounds = array<i64: 1, 128>}, {transform_indices = @transform_2, window_bounds = array<i64: 8, 128>}]} {
    %c0 = arith.constant 0 : index
    %c0_0 = arith.constant 0 : index
    %0 = vector.load %arg2[%c0, %c0_0] : memref<8x128xf32, #tpu.memory_space<vmem>>, vector<8x128xf32>
    %c0_1 = arith.constant 0 : index
    %c0_2 = arith.constant 0 : index
    %1 = vector.load %arg3[%c0_1, %c0_2] : memref<1x128xf32, #tpu.memory_space<vmem>>, vector<1x128xf32>
    %2 = vector.broadcast %1 : vector<1x128xf32> to vector<8x128xf32>
    %3 = arith.mulf %0, %2 : vector<8x128xf32>
    %c0_3 = arith.constant 0 : index
    %c0_4 = arith.constant 0 : index
    %4 = vector.load %arg4[%c0_3, %c0_4] : memref<8x128xf32, #tpu.memory_space<vmem>>, vector<8x128xf32>
    tpu.vector_store %arg4[%c0_3, %c0_4], %3 {strides = array<i32>} : memref<8x128xf32, #tpu.memory_space<vmem>>, vector<8x128xf32>,
    return
  }
  func.func @transform_0(%arg0: i32, %arg1: i32) -> (i32, i32) {
    %c0_i32 = arith.constant 0 : i32
    return %arg1, %arg0 : i32, i32
  }
  func.func @transform_1(%arg0: i32, %arg1: i32) -> (i32, i32) {
    %c0_i32 = arith.constant 0 : i32
    %c0_i32_0 = arith.constant 0 : i32
    return %c0_i32, %arg0 : i32, i32
  }
  func.func @transform_2(%arg0: i32, %arg1: i32) -> (i32, i32) {
    %c0_i32 = arith.constant 0 : i32
    return %arg1, %arg0 : i32, i32
  }
}

</mosaic_0001>

<bundles_post_ra>
// kernel: tpu_custom_call.1
= control target key start
LH: loop header
LB: loop body
LE: loop exit
PB: predicated region body
PF: predicated region fallthrough
CT: control target
= control target key end

     0   :  { %7 = vsyncpa [#allocation3], 0  ;;  %s714_s0 = inlined_call_operand.hbm [shape: f32[8,256], index: 0, kind: input, shape index: {}]   ;;  %s715_s1 = inlined_call_operand.hbm [shape: f32[1,256], index: 1, kind: input, shape index: {}]   ;;  %s716_s2 = inlined_call_operand.hbm [shape: f32[8,256], index: 2, kind: output, shape index: {}]  }
   0x1   :  { %9 = vsyncpa [#allocation3 + $0x1], 0 }
   0x2   :  { %10 = vsyncpa [#allocation6], 0 }
   0x3   :  { %12 = vsyncpa [#allocation6 + $0x1], 0 }
   0x4   :  { %13 = vsyncpa [#allocation4], 0 }
   0x5   :  { %15 = vsyncpa [#allocation4 + $0x1], 0  ;;  %s584_s9 = smov 0   ;;  %s586_s10 = smov 0  }
   0x6   :  { %s588_s11 = smov 0   ;;  %s590_s12 = smov 0  }
   0x7   :  { %s592_s13 = smov 0   ;;  %s594_s14 = smov 0  }
   0x8 LB: > { %s340_s15 = sadd.s32 4294967295, %s567_s14   ;;  %s341_s16 = sadd.s32 4294967294, %s567_s14   ;;  %s567_s14 = sphi %s594_s14, %s21_s14   ;;  %s563_s13 = sphi %s592_s13, %s725_s13   ;;  %s559_s12 = sphi %s590_s12, %s724_s12   ;;  %s555_s11 = sphi %s588_s11, %s723_s11   ;;  %s551_s10 = sphi %s586_s10, %s722_s10   ;;  %s547_s9 = sphi %s584_s9, %s721_s9  }
   0x9   : > { %s33_s17 = sadd.s32 1, %s563_s13  ;;  %s42_s18 = sadd.s32 1, %s555_s11 }
   0xa   : > { %p35_p0 = scmp.ge.s32.totalorder %s33_s17, 2  ;;  %p49_p1 = scmp.ne.s32.totalorder %s555_s11, %s551_s10 }
   0xb   : > { %p50_p2 = scmp.eq.s32.totalorder %s567_s14, 0  ;;  %p55_p3 = scmp.ne.s32.totalorder %s551_s10, %s547_s9 }
   0xc   : > { %s727_s17 = smov (%p35_p0, %s33_s17), 0  ;;  %p56_p5 = scmp.eq.s32.totalorder %s340_s15, 0 }
   0xd   : > { %p625_p4 = por %p50_p2, %p49_p1  ;;  %s38_s20 = ssub.s32 %s563_s13, %s727_s17 }
   0xe   : > { %p107_p6 = scmp.eq.s32.totalorder %s340_s15, 1  ;;  %p40_p7 = scmp.eq.s32.totalorder %s38_s20, 0 }
   0xf   : > { %p631_p8 = por %p56_p5, %p55_p3  ;;  %p113_p10 = scmp.eq.s32.totalorder %s341_s16, 1 }
  0x10   : > { %p635_p9 = por %p107_p6, %p49_p1  ;;  %p343_p12 = scmp.ge.s32.totalorder %s567_s14, 2 }
  0x11   : > { %s640_s23 = scalar_select %p40_p7, %s555_s11, %s42_s18  }
  0x12   : > { %p642_p11 = por %p113_p10, %p55_p3  ;;  %p370_p13 = scmp.lt.s32.totalorder %s567_s14, 2 }
  0x13   : > { %s133_s25 = sand.u32 1, %s555_s11   ;;  %s345_s27 = sshll.u32 %s563_s13, 3 }
  0x14   : > { %s344_s26 = sshll.u32 %s133_s25, 3  ;;  %s143_s30 = scalar_lea.hbm %s714_s0, %s345_s27 }
  0x15   : > { %s137_s3 = scalar_lea.vmem [#allocation2], %s344_s26  ;;  %s145_s5 = sshll.u32 %s143_s30, 4  ;;  %s146_s5 = int_to_ptr.hbm [resolvable:$true] %s145_s5 }
  0x16   : > { %s147_s4 = sshll.u32 %s137_s3, 4  ;;  %p360_p0 = pnand %p370_p13, %p625_p4  ;;  %s148_s4 = int_to_ptr.vmem [resolvable:$true] %s147_s4 }
  0x17   : > { %p346_p1 = scmp.ge.s32.totalorder %s567_s14, 1  ;;  %p169_p2 = scmp.lt.s32.totalorder %s567_s14, 3 }
  0x18   : > { %s134_s6 = scalar_lea.sflag [#allocation3], %s133_s25  ;;  %s160_s15 = scalar_lea.hbm %s715_s1, %s563_s13 }
  0x19   : > { %362 = dma.hbm_to_vmem [thread:$0]  (!%p360_p0), %s146_s5, 128, %s148_s4, %s134_s6  }
  0x1a   : > { %p170_p3 = pnand %p346_p1, %p169_p2  ;;  %s157_s16 = scalar_lea.vmem [#allocation5], %s133_s25 }
  0x1b   : > { %s164_s18 = sshll.u32 %s157_s16, 4  ;;  %s162_s20 = sshll.u32 %s160_s15, 4  ;;  %s165_s18 = int_to_ptr.vmem [resolvable:$true] %s164_s18  ;;  %s163_s20 = int_to_ptr.hbm [resolvable:$true] %s162_s20 }
  0x1c   : > { %s155_s26 = scalar_lea.sflag [#allocation6], %s133_s25  ;;  %173 = sbr.rel (%p170_p3) target bundleno = 51 (0x33), region = 28 }
  0x1d   : > { %365 = dma.hbm_to_vmem [thread:$0]  (!%p360_p0), %s163_s20, 16, %s165_s18, %s155_s26  }
  0x1e   : > { %s662_s19 = sand.u32 (!%p170_p3), 1, %s551_s10  }
  0x1f   : > { %s347_s27 = sshll.u32 (!%p170_p3), %s662_s19, 3  ;;  %s176_s28 = scalar_lea.sflag (!%p170_p3), [#allocation3], %s662_s19 }
  0x20   : > { %s179_s29 = scalar_lea.vmem (!%p170_p3), [#allocation2], %s347_s27 }
  0x21   : > { %534 = dma.done.wait (%p631_p8), %s176_s28, 128  }
  0x22   : > { %536 = vsyncadd (%p631_p8), %s176_s28, 4294967168  ;;  %s186_s25 = scalar_lea.sflag [#allocation6], %s662_s19  ;;  %s188_s30 = scalar_lea.vmem [#allocation5], %s662_s19 }
  0x23   : > { %538 = dma.done.wait (%p631_p8), %s186_s25, 16  }
  0x24   : > { %540 = vsyncadd (%p631_p8), %s186_s25, 4294967280  ;;  %s350_s3 = sshll.u32 %s559_s12, 3  ;;  %s213_s7 = scalar_lea.vmem [#allocation7], %s347_s27  ;;  %v214_v0 = vld [vmem:[%s179_s29] sm:$0xff] }
  0x25   : > { %s234_s6 = scalar_lea.hbm %s716_s2, %s350_s3  ;;  %s236_s8 = sshll.u32 %s213_s7, 4  ;;  %v420_v1 = vld [vmem:[%s188_s30] ss:$0 sm:$0xff]  ;;  %s237_s8 = int_to_ptr.vmem [resolvable:$true] %s236_s8 }
  0x26   : > { %s238_s15 = sshll.u32 %s234_s6, 4  ;;  %v219_v2 = vmul.f32 %v420_v1, %v214_v0  ;;  %s222_s16 = scalar_lea.sflag [#allocation4], %s662_s19  ;;  %s239_s15 = int_to_ptr.hbm [resolvable:$true] %s238_s15 }
  0x27   : > { %s495_s21 = sshra.s32 %s239_s15, 4  ;;  %s501_s26 = scalar_lea.hbm %s716_s2, 16  ;;  %s496_s21 = int_to_ptr.hbm [resolvable:$true] %s495_s21 }
  0x28   : > { %220 = vst [vmem:[%s213_s7] sm:$0xff] %v219_v2  ;;  %s497_s18 = scalar_lea.hbm %s496_s21, 8  ;;  %p502_p7 = scmp.lt.s32.totalorder %s496_s21, %s716_s2 }
  0x29   : > { %p498_p4 = scmp.ne.s32.totalorder %s496_s21, %s497_s18  ;;  %p503_p8 = scmp.lt.s32.totalorder %s501_s26, %s497_s18 }
  0x2b   : > { %p499_p5 = pnand %p498_p4, %p635_p9  ;;  %p504_p10 = por %p503_p8, %p502_p7 }
  0x2d   : > { %p500_p6 = pneg %p499_p5 }
  0x2f   : > { %p505_p13 = pnand %p504_p10, %p500_p6 }
  0x31   : > { %508 = shalt.err (!%p505_p13)
}
  0x32   : > { %357 = dma.vmem_to_hbm [thread:$0]  (%p635_p9), %s237_s8, 128, %s239_s15, %s222_s16  }
  0x33 PF: > { %s250_s19 = sand.u32 1, %s547_s9   ;;  %p367_p0 = pnand %p343_p12, %p642_p11 }
  0x34   : > { %s251_s29 = scalar_lea.sflag [#allocation4], %s250_s19 }
  0x35   : > { %p368_p1 = pneg %p367_p0 }
  0x37   : > { %542 = dma.done.wait (%p368_p1), %s251_s29, 128  }
  0x38   : > { %544 = vsyncadd (%p368_p1), %s251_s29, 4294967168  ;;  %s21_s14 = sadd.s32 1, %s567_s14   ;;  %s721_s9 = smov %s551_s10 }
  0x39   : > { %p18_p2 = scmp.ge.s32.totalorder %s21_s14, 4   ;;  %s722_s10 = smov %s555_s11 }
  0x3a   : > { %s723_s11 = smov %s640_s23  ;;  %s724_s12 = smov %s563_s13 }
  0x3b   : > { %s725_s13 = smov %s727_s17  ;;  %20 = sbr.rel (!%p18_p2) target bundleno = 8 (0x8), region = 86 }
  0x40   :  { %257 = vsyncpa [#allocation3], 1 }
  0x41   :  { %259 = vsyncpa [#allocation3 + $0x1], 1 }
  0x42   :  { %260 = vsyncpa [#allocation6], 1 }
  0x43   :  { %262 = vsyncpa [#allocation6 + $0x1], 1 }
  0x44   :  { %263 = vsyncpa [#allocation4], 1 }
  0x45   :  { %265 = vsyncpa [#allocation4 + $0x1], 1 }

</bundles_post_ra>
